<compile_context>
chip_gen: v7x
topology: tpu7x:2x2x1
jax: 0.10.0
libtpu: 0.0.40
codegen_flags: <defaults>
</compile_context>

<pallas_src>
import functools

import jax
import jax.numpy as jnp
from jax.experimental import pallas as pl
from jax.experimental.pallas import tpu as pltpu

EPS = 1e-8                 # softadapt epsilon (10 ** -8)
HISTORY_CAP = 100          # update fires once the history holds CAP + 1 points
LANES = 128                # loss-component axis, padded to the TPU lane width
RING = 8                   # ring depth: last RING recorded loss points (>= stencil)

# Backward finite-difference coefficients, first derivative, accuracy order 5
# (applied to the last 6 recorded points, oldest -> newest).
_FD_COEFFS = (-1.0 / 5.0, 5.0 / 4.0, -10.0 / 3.0, 5.0, -5.0, 137.0 / 60.0)

assert RING >= len(_FD_COEFFS)
assert HISTORY_CAP + 1 >= len(_FD_COEFFS)


# ---------------------------------------------------------------------------
# Fused K-step kernel: history append + conditional weight update + loss
# ---------------------------------------------------------------------------
def _softadapt_steps_kernel(count_ref, losses_ref, w_in_ref, acc_in_ref,
                            ring_in_ref, loss_ref, count_out_ref, w_out_ref,
                            acc_out_ref, ring_out_ref, *, beta, n_components,
                            cap, num_steps):
    # count_ref   : (1,)          i32 SMEM  -- points recorded before this launch
    # losses_ref  : (K, LANES)    f32 VMEM  -- K steps of losses (zero padded)
    # w_in_ref    : (1, LANES)    f32 VMEM  -- current adapt weights (zero padded)
    # acc_in_ref  : (2, LANES)    f32 VMEM  -- row 0: running sum, row 1: Kahan comp
    # ring_in_ref : (RING, LANES) f32 VMEM  -- last RING recorded loss points
    # loss_ref    : (K, LANES)    f32 VMEM  -- per-step weighted loss (lane-broadcast)

    # Carry the (tiny, aliased) recurrent state into the output buffers once.
    count_out_ref[0] = count_ref[0]
    w_out_ref[...] = w_in_ref[...]
    acc_out_ref[...] = acc_in_ref[...]
    ring_out_ref[...] = ring_in_ref[...]

    lane = jax.lax.broadcasted_iota(jnp.int32, (1, LANES), 1)
    valid = lane < n_components
    num_points = cap + 1                      # history length at update time
    base = num_points - len(_FD_COEFFS)       # count of the oldest stencil point

    @pl.loop(0, num_steps)
    def _step(k):
        c = count_out_ref[0]                  # points recorded before this step
        row = losses_ref[pl.ds(k, 1), :]      # (1, LANES) this step's losses
        # Kahan-compensated running sum of the history window.
        s_old = acc_out_ref[0:1, :]
        y = row - acc_out_ref[1:2, :]
        s_new = s_old + y
        new_count = c + 1
        do_update = new_count > cap

        @pl.when(do_update)
        def _update():
            # Per-component mean loss over the cap+1 recorded points.
            avg = s_new * (1.0 / num_points)
            # Rate of change: 5th-order backward finite difference on the last
            # 6 recorded points.  The newest point is `row` itself; the 5 older
            # points sit at *static* ring slots (counts cap-5 .. cap-1), so no
            # dynamic reads and no RAW hazard (the ring append is skipped on
            # update steps -- the history is cleared right after anyway).
            slope = _FD_COEFFS[-1] * row
            for j in range(len(_FD_COEFFS) - 1):
                r = (base + j) % RING
                slope = slope + _FD_COEFFS[j] * ring_out_ref[r:r + 1, :]
            # Loss-weighted softmax with temperature beta, max-shift, epsilon.
            m = jnp.max(jnp.where(valid, slope, -jnp.inf), axis=1, keepdims=True)
            e = jnp.where(valid, jnp.exp(beta * (slope - m)) * avg, 0.0)
            denom = jnp.sum(e, axis=1, keepdims=True) + EPS
            w_new = e * pl.reciprocal(denom, approx=True)    # divide on the EUP
            w_out_ref[...] = w_new
            acc_out_ref[...] = jnp.zeros_like(acc_out_ref)   # history cleared
            count_out_ref[0] = jnp.int32(0)
            # Weighted loss with the freshly updated weights (local value; the
            # ref is not re-read), matching the reference forward() ordering.
            loss_ref[pl.ds(k, 1), :] = jnp.broadcast_to(
                jnp.sum(w_new * row, axis=1, keepdims=True), (1, LANES))

        @pl.when(jnp.logical_not(do_update))
        def _append():
            slot = c % RING
            ring_out_ref[pl.ds(slot, 1), :] = row            # append to the ring
            acc_out_ref[0:1, :] = s_new
            acc_out_ref[1:2, :] = (s_new - s_old) - y        # Kahan compensation
            count_out_ref[0] = new_count
            loss_ref[pl.ds(k, 1), :] = jnp.broadcast_to(
                jnp.sum(w_out_ref[...] * row, axis=1, keepdims=True), (1, LANES))


def _build_train_steps(n, beta, cap, num_steps):
    kernel = functools.partial(_softadapt_steps_kernel, beta=float(beta),
                               n_components=int(n), cap=int(cap),
                               num_steps=int(num_steps))
    call = pl.pallas_call(
        kernel,
        out_shape=(
            jax.ShapeDtypeStruct((num_steps, LANES), jnp.float32),  # per-step losses
            jax.ShapeDtypeStruct((1,), jnp.int32),                  # history length
            jax.ShapeDtypeStruct((1, LANES), jnp.float32),          # adapt weights
            jax.ShapeDtypeStruct((2, LANES), jnp.float32),          # running sum + comp
            jax.ShapeDtypeStruct((RING, LANES), jnp.float32),       # FD ring buffer
        ),
        in_specs=[
            pl.BlockSpec(memory_space=pltpu.MemorySpace.SMEM),      # count
            pl.BlockSpec(memory_space=pltpu.MemorySpace.VMEM),      # losses (K, LANES)
            pl.BlockSpec(memory_space=pltpu.MemorySpace.VMEM),      # weights
            pl.BlockSpec(memory_space=pltpu.MemorySpace.VMEM),      # running sum
            pl.BlockSpec(memory_space=pltpu.MemorySpace.VMEM),      # ring
        ],
        out_specs=(
            pl.BlockSpec(memory_space=pltpu.MemorySpace.VMEM),
            pl.BlockSpec(memory_space=pltpu.MemorySpace.SMEM),
            pl.BlockSpec(memory_space=pltpu.MemorySpace.VMEM),
            pl.BlockSpec(memory_space=pltpu.MemorySpace.VMEM),
            pl.BlockSpec(memory_space=pltpu.MemorySpace.VMEM),
        ),
        # Alias ALL carried state in place: count, weights, sum, ring (P8).
        input_output_aliases={0: 1, 2: 2, 3: 3, 4: 4},
    )

    @jax.jit
    def run(losses_2d, count, weights_row, acc, ring):
        losses_pad = jnp.pad(losses_2d.astype(jnp.float32),
                             ((0, 0), (0, LANES - n)))
        loss_rows, new_count, new_w, new_acc, new_ring = call(
            count, losses_pad, weights_row, acc, ring)
        return loss_rows[:, 0], new_count, new_w, new_acc, new_ring

    return run


def _build_weighted_sum(n):
    @jax.jit
    def weighted_sum(losses_vec, weights_row):
        # Eval path: at N~4 a pallas_call is pure launch overhead; keep the
        # weighted sum as a fused XLA dot inside jit.
        return jnp.dot(weights_row[0, :n], losses_vec.astype(jnp.float32))
    return weighted_sum


# ---------------------------------------------------------------------------
# Stateful Python wrapper mirroring the PyTorch module semantics
# ---------------------------------------------------------------------------
class SoftAdaptModule:
    def __init__(self, beta: float):
        self.beta = float(beta)
        self._n = None
        self._weights_row = None   # (1, LANES) f32; live weights in lanes [0, n)
        self._acc = None           # (2, LANES) f32; running sum + Kahan compensation
        self._ring = None          # (RING, LANES) f32; last RING recorded loss points
        self._count = None         # (1,) i32; number of recorded history points
        self._train_fns = {}       # num_steps -> jitted fused step function
        self._weighted_sum = None

    @property
    def adapt_weights(self):
        if self._weights_row is None:
            return None
        return self._weights_row[0, :self._n]

    def _lazy_init(self, n: int):
        assert 0 < n <= LANES
        self._n = n
        self._weights_row = jnp.zeros((1, LANES), jnp.float32).at[0, :n].set(1.0)
        self._acc = jnp.zeros((2, LANES), jnp.float32)
        self._ring = jnp.zeros((RING, LANES), jnp.float32)
        self._count = jnp.zeros((1,), jnp.int32)
        self._weighted_sum = _build_weighted_sum(n)

    def _run_train(self, losses_2d):
        num_steps = int(losses_2d.shape[0])
        fn = self._train_fns.get(num_steps)
        if fn is None:
            fn = _build_train_steps(self._n, self.beta, HISTORY_CAP, num_steps)
            self._train_fns[num_steps] = fn
        per_step, self._count, self._weights_row, self._acc, self._ring = fn(
            losses_2d, self._count, self._weights_row, self._acc, self._ring)
        return per_step

    def __call__(self, losses, training: bool):
        # `losses` is a single (N,) device array (fast path) or a list of
        # scalars (API parity with the reference).
        losses_vec = jnp.asarray(losses, dtype=jnp.float32).reshape(-1)
        n = int(losses_vec.shape[0])
        if self._weights_row is None:
            self._lazy_init(n)
        if training:
            return self._run_train(losses_vec.reshape(1, n))[0]
        return self._weighted_sum(losses_vec, self._weights_row)

    def train_many(self, losses_batch):
        """Run K training steps in ONE pallas_call.  losses_batch: (K, N)."""
        losses_2d = jnp.asarray(losses_batch, dtype=jnp.float32)
        losses_2d = losses_2d.reshape(losses_2d.shape[0], -1)
        if self._weights_row is None:
            self._lazy_init(int(losses_2d.shape[1]))
        return self._run_train(losses_2d)


# ---------------------------------------------------------------------------
if __name__ == "__main__":
    key = jax.random.PRNGKey(0)
    N = 4            # number of loss components
    STEPS = 102      # 101st append exceeds the 100-point cap -> in-kernel update
    module = SoftAdaptModule(beta=0.1)

    # Deterministic synthetic per-component losses for all steps, built once as
    # a single (STEPS, N) device array (no Python lists of 0-d device scalars).
    base = jax.random.uniform(key, (N,), dtype=jnp.float32) + 0.5
    decay = jnp.arange(1, N + 1, dtype=jnp.float32)
    t = jnp.arange(STEPS, dtype=jnp.float32)[:, None]
    losses_mat = base[None, :] * jnp.exp(-0.01 * t * decay[None, :])   # (STEPS, N)

    # 102 training steps in ONE kernel launch; the SoftAdapt weight update fires
    # inside the kernel at step index 100 and step 101 runs with fresh weights.
    per_step_losses = module.train_many(losses_mat)

    out_single = module(losses_mat[-1], training=True)    # single-step training path
    out_eval = module(losses_mat[-1], training=False)     # eval path: no append/update

    jax.block_until_ready((per_step_losses, out_single, out_eval))
    w = module.adapt_weights
    assert per_step_losses.shape == (STEPS,)
    assert bool(jnp.all(jnp.isfinite(per_step_losses)))
    assert out_single.shape == () and bool(jnp.isfinite(out_single))
    assert out_eval.shape == () and bool(jnp.isfinite(out_eval))
    assert w.shape == (N,) and bool(jnp.all(jnp.isfinite(w)))
    # Before the first update the weights are all ones, so step 0's weighted
    # loss must equal the plain sum of its components.
    ref0 = float(jnp.sum(losses_mat[0]))
    assert abs(float(per_step_losses[0]) - ref0) <= 1e-5 * max(1.0, abs(ref0))
    print("KERNEL_OK")
</pallas_src>

<mosaic_0001>
module attributes {stable_mosaic.version = 11 : i64} {
  func.func @_softadapt_steps_kernel(%arg0: memref<1xi32, #tpu.memory_space<smem>>, %arg1: memref<102x128xf32, #tpu.memory_space<vmem>>, %arg2: memref<1x128xf32, #tpu.memory_space<vmem>>, %arg3: memref<2x128xf32, #tpu.memory_space<vmem>>, %arg4: memref<8x128xf32, #tpu.memory_space<vmem>>, %arg5: memref<102x128xf32, #tpu.memory_space<vmem>>, %arg6: memref<1xi32, #tpu.memory_space<smem>>, %arg7: memref<1x128xf32, #tpu.memory_space<vmem>>, %arg8: memref<2x128xf32, #tpu.memory_space<vmem>>, %arg9: memref<8x128xf32, #tpu.memory_space<vmem>>) attributes {dimension_semantics = [], scalar_prefetch = 0 : i64, scratch_operands = 0 : i64, tpu.core_type = #tpu.core_type<tc>} {
    %c0 = arith.constant 0 : index
    %0 = memref.load %arg0[%c0] : memref<1xi32, #tpu.memory_space<smem>>
    %c0_0 = arith.constant 0 : index
    %1 = memref.load %arg6[%c0_0] : memref<1xi32, #tpu.memory_space<smem>>
    memref.store %0, %arg6[%c0_0] : memref<1xi32, #tpu.memory_space<smem>>
    %c0_1 = arith.constant 0 : index
    %c0_2 = arith.constant 0 : index
    %2 = vector.load %arg2[%c0_1, %c0_2] : memref<1x128xf32, #tpu.memory_space<vmem>>, vector<1x128xf32>
    %c0_3 = arith.constant 0 : index
    %c0_4 = arith.constant 0 : index
    %3 = vector.load %arg7[%c0_3, %c0_4] : memref<1x128xf32, #tpu.memory_space<vmem>>, vector<1x128xf32>
    tpu.vector_store %arg7[%c0_3, %c0_4], %2 {strides = array<i32>} : memref<1x128xf32, #tpu.memory_space<vmem>>, vector<1x128xf32>,
    %c0_5 = arith.constant 0 : index
    %c0_6 = arith.constant 0 : index
    %4 = vector.load %arg3[%c0_5, %c0_6] : memref<2x128xf32, #tpu.memory_space<vmem>>, vector<2x128xf32>
    %c0_7 = arith.constant 0 : index
    %c0_8 = arith.constant 0 : index
    %5 = vector.load %arg8[%c0_7, %c0_8] : memref<2x128xf32, #tpu.memory_space<vmem>>, vector<2x128xf32>
    tpu.vector_store %arg8[%c0_7, %c0_8], %4 {strides = array<i32>} : memref<2x128xf32, #tpu.memory_space<vmem>>, vector<2x128xf32>,
    %c0_9 = arith.constant 0 : index
    %c0_10 = arith.constant 0 : index
    %6 = vector.load %arg4[%c0_9, %c0_10] : memref<8x128xf32, #tpu.memory_space<vmem>>, vector<8x128xf32>
    %c0_11 = arith.constant 0 : index
    %c0_12 = arith.constant 0 : index
    %7 = vector.load %arg9[%c0_11, %c0_12] : memref<8x128xf32, #tpu.memory_space<vmem>>, vector<8x128xf32>
    tpu.vector_store %arg9[%c0_11, %c0_12], %6 {strides = array<i32>} : memref<8x128xf32, #tpu.memory_space<vmem>>, vector<8x128xf32>,
    %8 = tpu.iota {dimensions = array<i32: 1>} : vector<1x128xi32>
    %c4_i32 = arith.constant 4 : i32
    %9 = vector.broadcast %c4_i32 : i32 to vector<1x128xi32>
    %10 = arith.cmpi slt, %8, %9 : vector<1x128xi32>
    %c0_i32 = arith.constant 0 : i32
    %c102_i32 = arith.constant 102 : i32
    %11 = arith.addi %c0_i32, %c102_i32 : i32
    %c1_i32 = arith.constant 1 : i32
    scf.for %arg10 = %c0_i32 to %11 step %c1_i32  : i32 {
      %c1_i32_14 = arith.constant 1 : i32
      %12 = arith.muli %arg10, %c1_i32_14 : i32
      %c0_i32_15 = arith.constant 0 : i32
      %13 = arith.addi %c0_i32_15, %12 : i32
      %c0_16 = arith.constant 0 : index
      %14 = memref.load %arg6[%c0_16] : memref<1xi32, #tpu.memory_space<smem>>
      %15 = arith.index_cast %13 : i32 to index
      %c0_17 = arith.constant 0 : index
      %16 = vector.load %arg1[%15, %c0_17] : memref<102x128xf32, #tpu.memory_space<vmem>>, vector<1x128xf32>
      %c0_18 = arith.constant 0 : index
      %c0_19 = arith.constant 0 : index
      %17 = vector.load %arg8[%c0_18, %c0_19] : memref<2x128xf32, #tpu.memory_space<vmem>>, vector<1x128xf32>
      %c1 = arith.constant 1 : index
      %c0_20 = arith.constant 0 : index
      %18 = vector.load %arg8[%c1, %c0_20] : memref<2x128xf32, #tpu.memory_space<vmem>>, vector<1x128xf32>
      %19 = arith.subf %16, %18 : vector<1x128xf32>
      %20 = arith.addf %17, %19 : vector<1x128xf32>
      %c1_i32_21 = arith.constant 1 : i32
      %21 = arith.addi %14, %c1_i32_21 : i32
      %c100_i32 = arith.constant 100 : i32
      %22 = arith.cmpi sgt, %21, %c100_i32 : i32
      %23 = arith.extui %22 : i1 to i32
      %c0_i32_22 = arith.constant 0 : i32
      %24 = arith.cmpi ne, %23, %c0_i32_22 : i32
      scf.if %24 {
        %cst = arith.constant 9.900990e-03 : f32
        %28 = vector.broadcast %cst : f32 to vector<1x128xf32>
        %29 = arith.mulf %20, %28 : vector<1x128xf32>
        %cst_24 = arith.constant 2.2833333 : f32
        %30 = vector.broadcast %cst_24 : f32 to vector<1x128xf32>
        %31 = arith.mulf %30, %16 : vector<1x128xf32>
        %c7 = arith.constant 7 : index
        %c0_25 = arith.constant 0 : index
        %32 = vector.load %arg9[%c7, %c0_25] : memref<8x128xf32, #tpu.memory_space<vmem>>, vector<1x128xf32>
        %cst_26 = arith.constant -2.000000e-01 : f32
        %33 = vector.broadcast %cst_26 : f32 to vector<1x128xf32>
        %34 = arith.mulf %33, %32 : vector<1x128xf32>
        %35 = arith.addf %31, %34 : vector<1x128xf32>
        %c0_27 = arith.constant 0 : index
        %c0_28 = arith.constant 0 : index
        %36 = vector.load %arg9[%c0_27, %c0_28] : memref<8x128xf32, #tpu.memory_space<vmem>>, vector<1x128xf32>
        %cst_29 = arith.constant 1.250000e+00 : f32
        %37 = vector.broadcast %cst_29 : f32 to vector<1x128xf32>
        %38 = arith.mulf %37, %36 : vector<1x128xf32>
        %39 = arith.addf %35, %38 : vector<1x128xf32>
        %c1_30 = arith.constant 1 : index
        %c0_31 = arith.constant 0 : index
        %40 = vector.load %arg9[%c1_30, %c0_31] : memref<8x128xf32, #tpu.memory_space<vmem>>, vector<1x128xf32>
        %cst_32 = arith.constant -3.33333325 : f32
        %41 = vector.broadcast %cst_32 : f32 to vector<1x128xf32>
        %42 = arith.mulf %41, %40 : vector<1x128xf32>
        %43 = arith.addf %39, %42 : vector<1x128xf32>
        %c2 = arith.constant 2 : index
        %c0_33 = arith.constant 0 : index
        %44 = vector.load %arg9[%c2, %c0_33] : memref<8x128xf32, #tpu.memory_space<vmem>>, vector<1x128xf32>
        %cst_34 = arith.constant 5.000000e+00 : f32
        %45 = vector.broadcast %cst_34 : f32 to vector<1x128xf32>
        %46 = arith.mulf %45, %44 : vector<1x128xf32>
        %47 = arith.addf %43, %46 : vector<1x128xf32>
        %c3 = arith.constant 3 : index
        %c0_35 = arith.constant 0 : index
        %48 = vector.load %arg9[%c3, %c0_35] : memref<8x128xf32, #tpu.memory_space<vmem>>, vector<1x128xf32>
        %cst_36 = arith.constant -5.000000e+00 : f32
        %49 = vector.broadcast %cst_36 : f32 to vector<1x128xf32>
        %50 = arith.mulf %49, %48 : vector<1x128xf32>
        %51 = arith.addf %47, %50 : vector<1x128xf32>
        %cst_37 = arith.constant 0xFF800000 : f32
        %52 = vector.broadcast %cst_37 : f32 to vector<1x128xf32>
        %53 = arith.select %10, %51, %52 : vector<1x128xi1>, vector<1x128xf32>
        %cst_38 = arith.constant dense<0xFF800000> : vector<1xf32>
        %54 = vector.multi_reduction <maximumf>, %53, %cst_38 [1] : vector<1x128xf32> to vector<1xf32>
        %55 = vector.shape_cast %54 : vector<1xf32> to vector<1x1xf32>
        %56 = vector.broadcast %55 : vector<1x1xf32> to vector<1x128xf32>
        %57 = arith.subf %51, %56 : vector<1x128xf32>
        %cst_39 = arith.constant 1.000000e-01 : f32
        %58 = vector.broadcast %cst_39 : f32 to vector<1x128xf32>
        %59 = arith.mulf %58, %57 : vector<1x128xf32>
        %60 = math.exp %59 : vector<1x128xf32>
        %61 = arith.mulf %60, %29 : vector<1x128xf32>
        %cst_40 = arith.constant 0.000000e+00 : f32
        %62 = vector.broadcast %cst_40 : f32 to vector<1x128xf32>
        %63 = arith.select %10, %61, %62 : vector<1x128xi1>, vector<1x128xf32>
        %cst_41 = arith.constant dense<0.000000e+00> : vector<1xf32>
        %64 = vector.multi_reduction <add>, %63, %cst_41 [1] : vector<1x128xf32> to vector<1xf32>
        %65 = vector.shape_cast %64 : vector<1xf32> to vector<1x1xf32>
        %cst_42 = arith.constant 9.99999993E-9 : f32
        %66 = vector.broadcast %cst_42 : f32 to vector<1x1xf32>
        %67 = arith.addf %65, %66 : vector<1x1xf32>
        %68 = tpu.reciprocal %67 {approx = true} : vector<1x1xf32> -> vector<1x1xf32>
        %69 = vector.broadcast %68 : vector<1x1xf32> to vector<1x128xf32>
        %70 = arith.mulf %63, %69 : vector<1x128xf32>
        %c0_43 = arith.constant 0 : index
        %c0_44 = arith.constant 0 : index
        %71 = vector.load %arg7[%c0_43, %c0_44] : memref<1x128xf32, #tpu.memory_space<vmem>>, vector<1x128xf32>
        tpu.vector_store %arg7[%c0_43, %c0_44], %70 {strides = array<i32>} : memref<1x128xf32, #tpu.memory_space<vmem>>, vector<1x128xf32>,
        %cst_45 = arith.constant 0.000000e+00 : f32
        %72 = vector.broadcast %cst_45 : f32 to vector<2x128xf32>
        %c0_46 = arith.constant 0 : index
        %c0_47 = arith.constant 0 : index
        %73 = vector.load %arg8[%c0_46, %c0_47] : memref<2x128xf32, #tpu.memory_space<vmem>>, vector<2x128xf32>
        tpu.vector_store %arg8[%c0_46, %c0_47], %72 {strides = array<i32>} : memref<2x128xf32, #tpu.memory_space<vmem>>, vector<2x128xf32>,
        %c0_i32_48 = arith.constant 0 : i32
        %c0_49 = arith.constant 0 : index
        %74 = memref.load %arg6[%c0_49] : memref<1xi32, #tpu.memory_space<smem>>
        memref.store %c0_i32_48, %arg6[%c0_49] : memref<1xi32, #tpu.memory_space<smem>>
        %75 = arith.mulf %70, %16 : vector<1x128xf32>
        %cst_50 = arith.constant dense<0.000000e+00> : vector<1xf32>
        %76 = vector.multi_reduction <add>, %75, %cst_50 [1] : vector<1x128xf32> to vector<1xf32>
        %77 = vector.shape_cast %76 : vector<1xf32> to vector<1x1xf32>
        %78 = vector.shape_cast %77 : vector<1x1xf32> to vector<1x1xf32>
        %79 = vector.broadcast %78 : vector<1x1xf32> to vector<1x128xf32>
        %80 = arith.index_cast %13 : i32 to index
        %c0_51 = arith.constant 0 : index
        %81 = vector.load %arg5[%80, %c0_51] : memref<102x128xf32, #tpu.memory_space<vmem>>, vector<1x128xf32>
        tpu.vector_store %arg5[%80, %c0_51], %79 {strides = array<i32>} : memref<102x128xf32, #tpu.memory_space<vmem>>, vector<1x128xf32>,
      } else {
      }
      %true = arith.constant true
      %25 = arith.xori %22, %true : i1
      %26 = arith.extui %25 : i1 to i32
      %c0_i32_23 = arith.constant 0 : i32
      %27 = arith.cmpi ne, %26, %c0_i32_23 : i32
      scf.if %27 {
        %c8_i32 = arith.constant 8 : i32
        %c0_i32_24 = arith.constant 0 : i32
        %28 = arith.cmpi eq, %c8_i32, %c0_i32_24 : i32
        %c1_i32_25 = arith.constant 1 : i32
        %29 = arith.select %28, %c1_i32_25, %c8_i32 : i32
        %30 = arith.remsi %14, %29 : i32
        %c0_i32_26 = arith.constant 0 : i32
        %31 = arith.cmpi ne, %30, %c0_i32_26 : i32
        %c0_i32_27 = arith.constant 0 : i32
        %32 = arith.cmpi slt, %30, %c0_i32_27 : i32
        %c0_i32_28 = arith.constant 0 : i32
        %33 = arith.cmpi slt, %29, %c0_i32_28 : i32
        %34 = arith.xori %32, %33 : i1
        %35 = arith.andi %34, %31 : i1
        %36 = arith.addi %30, %29 : i32
        %37 = arith.select %35, %36, %30 : i32
        %38 = arith.index_cast %37 : i32 to index
        %c0_29 = arith.constant 0 : index
        %39 = vector.load %arg9[%38, %c0_29] : memref<8x128xf32, #tpu.memory_space<vmem>>, vector<1x128xf32>
        tpu.vector_store %arg9[%38, %c0_29], %16 {strides = array<i32>} : memref<8x128xf32, #tpu.memory_space<vmem>>, vector<1x128xf32>,
        %c0_30 = arith.constant 0 : index
        %c0_31 = arith.constant 0 : index
        %40 = vector.load %arg8[%c0_30, %c0_31] : memref<2x128xf32, #tpu.memory_space<vmem>>, vector<1x128xf32>
        tpu.vector_store %arg8[%c0_30, %c0_31], %20 {strides = array<i32>} : memref<2x128xf32, #tpu.memory_space<vmem>>, vector<1x128xf32>,
        %41 = arith.subf %20, %17 : vector<1x128xf32>
        %42 = arith.subf %41, %19 : vector<1x128xf32>
        %c1_32 = arith.constant 1 : index
        %c0_33 = arith.constant 0 : index
        %43 = vector.load %arg8[%c1_32, %c0_33] : memref<2x128xf32, #tpu.memory_space<vmem>>, vector<1x128xf32>
        tpu.vector_store %arg8[%c1_32, %c0_33], %42 {strides = array<i32>} : memref<2x128xf32, #tpu.memory_space<vmem>>, vector<1x128xf32>,
        %c0_34 = arith.constant 0 : index
        %44 = memref.load %arg6[%c0_34] : memref<1xi32, #tpu.memory_space<smem>>
        memref.store %21, %arg6[%c0_34] : memref<1xi32, #tpu.memory_space<smem>>
        %c0_35 = arith.constant 0 : index
        %c0_36 = arith.constant 0 : index
        %45 = vector.load %arg7[%c0_35, %c0_36] : memref<1x128xf32, #tpu.memory_space<vmem>>, vector<1x128xf32>
        %46 = arith.mulf %45, %16 : vector<1x128xf32>
        %cst = arith.constant dense<0.000000e+00> : vector<1xf32>
        %47 = vector.multi_reduction <add>, %46, %cst [1] : vector<1x128xf32> to vector<1xf32>
        %48 = vector.shape_cast %47 : vector<1xf32> to vector<1x1xf32>
        %49 = vector.shape_cast %48 : vector<1x1xf32> to vector<1x1xf32>
        %50 = vector.broadcast %49 : vector<1x1xf32> to vector<1x128xf32>
        %51 = arith.index_cast %13 : i32 to index
        %c0_37 = arith.constant 0 : index
        %52 = vector.load %arg5[%51, %c0_37] : memref<102x128xf32, #tpu.memory_space<vmem>>, vector<1x128xf32>
        tpu.vector_store %arg5[%51, %c0_37], %50 {strides = array<i32>} : memref<102x128xf32, #tpu.memory_space<vmem>>, vector<1x128xf32>,
      } else {
      }
    }
    %c102_i32_13 = arith.constant 102 : i32
    return
  }
}

</mosaic_0001>

<bundles_post_ra>
// kernel: run.1
= control target key start
LH: loop header
LB: loop body
LE: loop exit
PB: predicated region body
PF: predicated region fallthrough
CT: control target
= control target key end

     0   :  { %16 = vsyncpa [#allocation4], 0  ;;  %v36_v2 = vlaneseq  ;;  %s395_s0 = inlined_call_operand.<no memory space> [shape: s32[1], index: 0, kind: input, shape index: {}, may-alias: {0,6}]   ;;  %s396_s1 = inlined_call_operand.vmem [shape: f32[102,128], index: 1, kind: input, shape index: {}]   ;;  %s397_s2 = inlined_call_operand.vmem [shape: f32[1,128], index: 2, kind: input, shape index: {}, may-alias: {2,7}]   ;;  %s398_s3 = inlined_call_operand.vmem [shape: f32[2,128], index: 3, kind: input, shape index: {}, may-alias: {3,8}]   ;;  %s399_s4 = inlined_call_operand.vmem [shape: f32[8,128], index: 4, kind: input, shape index: {}, may-alias: {4,9}]   ;;  %s400_s5 = inlined_call_operand.vmem [shape: f32[102,128], index: 5, kind: output, shape index: {0}]   ;;  %s401_s6 = inlined_call_operand.hbm [shape: s32[1], index: 6, kind: output, shape index: {1}, may-alias: {0,6}]   ;;  %s402_s7 = inlined_call_operand.vmem [shape: f32[1,128], index: 7, kind: output, shape index: {2}, may-alias: {2,7}]   ;;  %s403_s8 = inlined_call_operand.vmem [shape: f32[2,128], index: 8, kind: output, shape index: {3}, may-alias: {3,8}]   ;;  %s404_s9 = inlined_call_operand.vmem [shape: f32[8,128], index: 9, kind: output, shape index: {4}, may-alias: {4,9}]  }
   0x1   :  { %29 = sst [smem:[#allocation3]] %s395_s0  ;;  %v30_v0 = vld [vmem:[%s397_s2] sm:$0x1]  ;;  %s286_s2 = smov 0  }
   0x2   :  { %v34_v1 = vld [vmem:[%s399_s4] sm:$0xff]  ;;  %31 = vst [vmem:[%s402_s7] sm:$0x1] %v30_v0  ;;  %v283_v4 = vand.u32 127, %v36_v2 }
   0x3   :  { %v32_v3 = vld [vmem:[%s398_s3] sm:$0x3]  ;;  %35 = vst [vmem:[%s404_s9] sm:$0xff] %v34_v1 }
   0x4   :  { %33 = vst [vmem:[%s403_s8] sm:$0x3] %v32_v3  ;;  %vm38_vm0 = vcmp.lt.s32.totalorder %v283_v4, 4 }
   0x5 LB: > { %s291_s3 = sld [smem:[#allocation3]]  ;;  %s46_s25 = scalar_lea.vmem %s396_s1, %s207_s2  ;;  %s207_s2 = sphi %s286_s2, %s44_s2  }
   0x6   : > { %v300_v6 = vld [vmem:[%s46_s25] sm:$0x1] }
   0xb   : > { %v49_v5 = vld [vmem:[%s403_s8 + $0x1] sm:$0x1]  ;;  %v305_v7 = vld [vmem:[%s403_s8] sm:$0x1]  ;;  %s315_s28 = sadd.s32 1, %s291_s3 }
   0xc   : > { %v308_v8 = vsub.f32 %v300_v6, %v49_v5  ;;  %p169_p0 = scmp.le.s32.totalorder %s315_s28, 100 }
   0xd   : > { %v58_v10 = vmul.f32 (!%p169_p0), 2.2833333, %v300_v6  ;;  %v59_v11 = vld [vmem:[%s404_s9 + $0x7] sm:$0x1] (!%p169_p0)  ;;  %v62_v12 = vld [vmem:[%s404_s9] sm:$0x1] (!%p169_p0)  ;;  %s98_s23 = scalar_lea.vmem (!%p169_p0), %s400_s5, %s207_s2 }
   0xe   : > { %v312_v9 = vadd.f32 %v308_v8, %v305_v7  ;;  %56 = sbr.rel (%p169_p0) target bundleno = 494 (0x1ee), region = 32  ;;  %v60_v13 = vmul.f32 (!%p169_p0), -0.2, %v59_v11  ;;  %v63_v14 = vmul.f32 (!%p169_p0), 1.25, %v62_v12  ;;  %v65_v15 = vld [vmem:[%s404_s9 + $0x1] sm:$0x1] (!%p169_p0) }
   0xf   : > { %v68_v16 = vld [vmem:[%s404_s9 + $0x2] sm:$0x1] (!%p169_p0)  ;;  %v66_v18 = vmul.f32 (!%p169_p0), -3.3333333, %v65_v15  ;;  %v71_v19 = vld [vmem:[%s404_s9 + $0x3] sm:$0x1] (!%p169_p0) }
  0x10   : > { %v61_v17 = vadd.f32 (!%p169_p0), %v60_v13, %v58_v10  ;;  %v69_v21 = vmul.f32 (!%p169_p0), 5.0, %v68_v16  ;;  %v72_v23 = vmul.f32 (!%p169_p0), -5.0, %v71_v19  ;;  %vm75_vm1 = vcmask (!%p169_p0), 1040384   ;;  %s210_s21 = smov (!%p169_p0), 0  }
  0x11   : > { %v57_v32 = vmul.f32 (!%p169_p0), 0.00990099, %v312_v9  ;;  %v209_v43 = vmov (!%p169_p0), 0.0   ;;  %93 = sst [smem:[#allocation3]] (!%p169_p0), %s210_s21 }
  0x12   : > { %v64_v20 = vadd.f32 (!%p169_p0), %v63_v14, %v61_v17  ;;  %92 = vst [vmem:[%s403_s8] sm:$0x3] (!%p169_p0), %v209_v43 }
  0x14   : > { %v67_v22 = vadd.f32 (!%p169_p0), %v66_v18, %v64_v20 }
  0x16   : > { %v70_v24 = vadd.f32 %v69_v21, %v67_v22 }
  0x18   : > { %v73_v25 = vadd.f32 %v72_v23, %v70_v24 }
  0x1a   : > { %v74_v26 = vsel %vm38_vm0, %v73_v25, -inf }
  0x1b   : > { %v76_v27 = vsel %vm75_vm1, %v74_v26, -inf }
  0x1c   : > { %77 = vmax.xlane.f32.xlu0 %v76_v27 }
  0xa9   : > { %v78_v28 = vpop.xlane.xlu0 %77 }
  0xaa   : > { %v79_v29 = vsub.f32 %v73_v25, %v78_v28 }
  0xac   : > { %v80_v30 = vmul.f32 0.1, %v79_v29 }
  0xae   : > { %v81_v31 = vmul.f32 1.442695, %v80_v30 }
  0xb0   : > { %185 = vpow2.f32 %v81_v31 }
  0xba   : > { %v186_v33 = vpop.eup %185 }
  0xbb   : > { %v83_v34 = vmul.f32 %v186_v33, %v57_v32 }
  0xbd   : > { %v84_v35 = vsel %vm38_vm0, %v83_v34, 0.0 }
  0xbe   : > { %v85_v36 = vsel %vm75_vm1, %v84_v35, 0.0 }
  0xbf   : > { %86 = vadd.xlane.f32.xlu0 %v85_v36 }
 0x14c   : > { %v87_v37 = vpop.xlane.xlu0 %86 }
 0x14d   : > { %v88_v38 = vadd.f32 1e-08, %v87_v37 }
 0x14f   : > { %187 = vrcp.f32 %v88_v38 }
 0x159   : > { %v188_v39 = vpop.eup %187 }
 0x15a   : > { %v90_v40 = vmul.f32 %v188_v39, %v84_v35 }
 0x15c   : > { %v94_v41 = vmul.f32 %v90_v40, %v300_v6  ;;  %91 = vst [vmem:[%s402_s7] sm:$0x1] %v90_v40 }
 0x15e   : > { %v95_v42 = vsel %vm75_vm1, %v94_v41, 0.0 }
 0x15f   : > { %96 = vadd.xlane.f32.xlu1 %v95_v42 }
 0x1ec   : > { %v97_v44 = vpop.xlane.xlu1 %96 }
 0x1ed   : > { %99 = vst [vmem:[%s98_s23] sm:$0x1] %v97_v44 }
 0x1ee PF: > { %p170_p1 = scmp.gt.s32.totalorder %s315_s28, 100 }
 0x1ef   : > { %p104_p2 = scmp.lt.s32.totalorder (!%p170_p1), %s291_s3, 0  ;;  %s105_s24 = ssub.s32 (!%p170_p1), 0, %s291_s3  ;;  %118 = vst [vmem:[%s403_s8] sm:$0x1] (!%p170_p1), %v312_v9  ;;  %v119_v45 = vsub.f32 (!%p170_p1), %v312_v9, %v305_v7  ;;  %v123_v46 = vld [vmem:[%s402_s7] sm:$0x1] (!%p170_p1)  ;;  %vm125_vm2 = vcmask (!%p170_p1), 1040384  }
 0x1f0   : > { %103 = sbr.rel (%p170_p1) target bundleno = 642 (0x282), region = 36  ;;  %s171_s30 = smin.u32 (!%p170_p1), %s105_s24, %s291_s3  ;;  %v124_v47 = vmul.f32 (!%p170_p1), %v123_v46, %v300_v6 }
 0x1f1   : > { %122 = sst [smem:[#allocation3]] (!%p170_p1), %s315_s28  ;;  %s107_s10 = sand.u32 (!%p170_p1), 7, %s171_s30   ;;  %v120_v48 = vsub.f32 (!%p170_p1), %v119_v45, %v308_v8 }
 0x1f2   : > { %s108_s11 = ssub.s32 (!%p170_p1), 0, %s107_s10  ;;  %v126_v49 = vsel (!%p170_p1), %vm125_vm2, %v124_v47, 0.0  ;;  %s129_s18 = scalar_lea.vmem (!%p170_p1), %s400_s5, %s207_s2 }
 0x1f3   : > { %121 = vst [vmem:[%s403_s8 + $0x1] sm:$0x1] (!%p170_p1), %v120_v48  ;;  %127 = vadd.xlane.f32.xlu0 (!%p170_p1), %v126_v49 }
 0x1f7   : > { %s406_s11 = smov (!%p104_p2, %s108_s11), %s107_s10 }
 0x1f8   : > { %p173_p3 = scmp.lt.s32.totalorder %s406_s11, 0  ;;  %s114_s14 = sadd.s32 8, %s406_s11 }
 0x1fa   : > { %s408_s14 = smov (!%p173_p3, %s114_s14), %s406_s11 }
 0x1fb   : > { %s116_s3 = scalar_lea.vmem %s404_s9, %s408_s14 }
 0x1fc   : > { %117 = vst [vmem:[%s116_s3] sm:$0x1] %v300_v6 }
 0x280   : > { %v128_v50 = vpop.xlane.xlu0 %127 }
 0x281   : > { %130 = vst [vmem:[%s129_s18] sm:$0x1] %v128_v50 }
 0x282 PF: > { %s44_s2 = sadd.s32 1, %s207_s2  }
 0x283   : > { %p41_p4 = scmp.ge.s32.totalorder %s44_s2, 102  }
 0x284   :  { %s189_s0 = scalar_lea.hbm (%p41_p4), %s401_s6, 16 }
 0x285   :  { %43 = sbr.rel (!%p41_p4) target bundleno = 5 (0x5), region = 92  ;;  %p190_p5 = scmp.ne.s32.totalorder (%p41_p4), %s401_s6, %s189_s0 }
 0x286   :  { %p193_p6 = scmp.lt.u32.totalorder (%p41_p4), %s189_s0, %s401_s6 }
 0x288   :  { %p195_p7 = pnand (%p41_p4), %p193_p6, %p190_p5 }
 0x28c   :  { %198 = shalt.err (!%p195_p7)
}
 0x28d   :  { %s211_s24 = smov [#allocation3]  }
 0x28e   :  { %140 = dma.smem_to_hbm %s211_s24, 16, %s401_s6, [#allocation4]  }
 0x28f   :  { %203 = dma.done.wait [#allocation4], 16  }
 0x290   :  { %204 = vsyncadd [#allocation4], 4294967280 }
 0x291   :  { %158 = sfence }
 0x292   :  { %159 = vsyncpa [#allocation4], 1 }

</bundles_post_ra>
